<compile_context>
chip_gen: v5e
topology: v5e:2x2
jax: 0.10.0
libtpu: 0.0.40
codegen_flags: <defaults>
</compile_context>

<pallas_src>
import functools

import jax
import jax.numpy as jnp
from jax.experimental import pallas as pl
from jax.experimental.pallas import tpu as pltpu

LANE = 128        # TPU lane width: hidden/output feature dims are padded to this
ROW_ALIGN = 16    # bf16 sublane-pair alignment for slab row offsets


def _round_up(n, m):
    return ((n + m - 1) // m) * m


# ---------------------------------------------------------------------------
# Kernel: one batch tile per grid step.  Parameter slab is VMEM-resident
# (constant index_map) and sliced with static, tile-aligned ref slices.
# ---------------------------------------------------------------------------
def _actor_kernel(obs, obs_pad, ma_ref, x_ref, p_ref, out_ref):
    o1 = obs_pad              # end of W1 rows
    o2 = o1 + LANE            # end of W2 rows
    o3 = o2 + LANE            # end of W3 rows
    o4 = o3 + LANE            # end of W4 rows

    w1 = p_ref[0:obs, :]      # (obs, 128)  bf16
    w2 = p_ref[o1:o2, :]      # (128, 128)
    w3 = p_ref[o2:o3, :]      # (128, 128)
    w4 = p_ref[o3:o4, :]      # (128, 128)
    # Biases: direct single-row ref slices (rows o4..o4+3), upcast to f32.
    b1 = p_ref[o4 + 0:o4 + 1, :].astype(jnp.float32)   # (1, 128)
    b2 = p_ref[o4 + 1:o4 + 2, :].astype(jnp.float32)
    b3 = p_ref[o4 + 2:o4 + 3, :].astype(jnp.float32)
    b4 = p_ref[o4 + 3:o4 + 4, :].astype(jnp.float32)

    ma = ma_ref[0]            # SMEM scalar (scalar prefetch)

    x = x_ref[...].astype(jnp.bfloat16)                 # (tile_b, obs)

    h = jnp.maximum(jnp.dot(x, w1, preferred_element_type=jnp.float32) + b1, 0.0)
    h = jnp.maximum(
        jnp.dot(h.astype(jnp.bfloat16), w2, preferred_element_type=jnp.float32) + b2, 0.0)
    h = jnp.maximum(
        jnp.dot(h.astype(jnp.bfloat16), w3, preferred_element_type=jnp.float32) + b3, 0.0)
    a = jnp.dot(h.astype(jnp.bfloat16), w4, preferred_element_type=jnp.float32) + b4

    out_ref[...] = (ma * jnp.tanh(a)).astype(out_ref.dtype)   # lane-dense store


# ---------------------------------------------------------------------------
# Host-side packing: w1..w4 (stored as (in, out)) and b1..b4 into one bf16 slab.
# Zero padding keeps the math exact in the padded lanes/rows.
# ---------------------------------------------------------------------------
def pack_params(params, *, param_dtype=jnp.bfloat16):
    w1, w2, w3, w4 = params["w1"], params["w2"], params["w3"], params["w4"]
    b1, b2, b3, b4 = params["b1"], params["b2"], params["b3"], params["b4"]
    obs, h1 = w1.shape
    h1b, h2 = w2.shape
    h2b, h2c = w3.shape
    h2d, act = w4.shape
    assert h1b == h1 and h2b == h2 and h2c == h2 and h2d == h2, "layer dims inconsistent"
    assert max(h1, h2, act) <= LANE, "hidden/action dims must be <= 128 for this kernel"
    assert obs >= 1
    obs_pad = _round_up(obs, ROW_ALIGN)

    def pad_block(w, rows, cols):
        blk = jnp.zeros((rows, cols), param_dtype)
        return blk.at[: w.shape[0], : w.shape[1]].set(w.astype(param_dtype))

    bias_block = jnp.zeros((ROW_ALIGN, LANE), param_dtype)
    bias_block = bias_block.at[0, :h1].set(b1.reshape(-1).astype(param_dtype))
    bias_block = bias_block.at[1, :h2].set(b2.reshape(-1).astype(param_dtype))
    bias_block = bias_block.at[2, :h2].set(b3.reshape(-1).astype(param_dtype))
    bias_block = bias_block.at[3, :act].set(b4.reshape(-1).astype(param_dtype))

    slab = jnp.concatenate(
        [
            pad_block(w1, obs_pad, LANE),   # rows [0, obs_pad)
            pad_block(w2, LANE, LANE),      # rows [obs_pad, obs_pad+128)
            pad_block(w3, LANE, LANE),
            pad_block(w4, LANE, LANE),
            bias_block,                     # last ROW_ALIGN rows (rows 0..3 = b1..b4)
        ],
        axis=0,
    )
    meta = {"obs": obs, "obs_pad": obs_pad, "act": act}
    return slab, meta


# ---------------------------------------------------------------------------
# Wrapper: batch-tiled pallas_call (no padded copy of x, ragged last tile OK).
# ---------------------------------------------------------------------------
def actor_forward(x, slab, meta, max_action, *, max_tile_b=1024):
    B, obs = x.shape
    assert B >= 1
    assert obs == meta["obs"], "x feature dim does not match packed params"
    obs_pad, act = meta["obs_pad"], meta["act"]
    n_rows = slab.shape[0]

    # Tiling: big tiles (per-step overhead ~0.35us), but >=2 steps when possible so
    # both v7x TensorCores get work; v5e/v6e don't care.  tile_b is a multiple of 8
    # (or equals B when tiny); Pallas handles the ragged last block.
    if B <= 8:
        tile_b = B
    else:
        tile_b = min(_round_up(pl.cdiv(B, 2), 8), max_tile_b)
    grid = (pl.cdiv(B, tile_b),)

    ma = jnp.full((1,), max_action, dtype=jnp.float32)

    out_padded = pl.pallas_call(
        functools.partial(_actor_kernel, obs, obs_pad),
        out_shape=jax.ShapeDtypeStruct((B, LANE), jnp.float32),
        grid_spec=pltpu.PrefetchScalarGridSpec(
            num_scalar_prefetch=1,                                   # max_action -> SMEM
            grid=grid,
            in_specs=[
                pl.BlockSpec((tile_b, obs), lambda i, _: (i, 0)),    # x tile streams
                pl.BlockSpec((n_rows, LANE), lambda i, _: (0, 0)),   # params resident
            ],
            out_specs=pl.BlockSpec((tile_b, LANE), lambda i, _: (i, 0)),
        ),
        compiler_params=pltpu.CompilerParams(
            dimension_semantics=("parallel",)),      # v7x: shard batch across 2 TCs
    )(ma, x, slab)

    # Only the first `act` lanes are real; padded lanes are exact zeros.
    return out_padded[:, :act]


# ---------------------------------------------------------------------------
# Deterministic init mirroring the module's _layer_norm:
#   orthogonal_(weight, std=1.0), constant_(bias, 1e-6)
# Weights stored as (in, out) = transpose of nn.Linear's (out, in).
# ---------------------------------------------------------------------------
def init_params(key, obs_dim, h1, h2, act_dim):
    ortho = jax.nn.initializers.orthogonal(scale=1.0)
    ks = jax.random.split(key, 4)
    dims = [(obs_dim, h1), (h1, h2), (h2, h2), (h2, act_dim)]
    params = {}
    for idx, (k, (din, dout)) in enumerate(zip(ks, dims), start=1):
        params[f"w{idx}"] = ortho(k, (din, dout), jnp.float32)
        params[f"b{idx}"] = jnp.full((1, dout), 1e-6, dtype=jnp.float32)
    return params


def reference_forward(x, params, max_action):
    h = jax.nn.relu(x @ params["w1"] + params["b1"])
    h = jax.nn.relu(h @ params["w2"] + params["b2"])
    h = jax.nn.relu(h @ params["w3"] + params["b3"])
    return max_action * jnp.tanh(h @ params["w4"] + params["b4"])


# TODO(synk): checkpoint save/load, Adam optimizer and device plumbing from the
# PyTorch module are training infrastructure, not forward math -- not ported.

if __name__ == "__main__":
    # Shapes consistent with the module's forward:
    # obs_shape[agent_id]=16, n_hiddens_1=32, n_hiddens_2=32, action_shape=4.
    # Batch 200 -> tile_b=104, grid of 2 tiles (second tile ragged, no padding copy).
    B, OBS, H1, H2, ACT = 200, 16, 32, 32, 4
    MAX_ACTION = 1.0

    key = jax.random.PRNGKey(0)
    kx, kp = jax.random.split(key)
    x = jax.random.normal(kx, (B, OBS), dtype=jnp.float32)
    params = init_params(kp, OBS, H1, H2, ACT)

    slab, meta = pack_params(params)

    out = actor_forward(x, slab, meta, MAX_ACTION)
    out = jax.block_until_ready(out)

    ref = reference_forward(x, params, MAX_ACTION)
    assert out.shape == (B, ACT)
    # bf16 weights/activations on the MXU (f32 accumulation) -> relaxed tolerance,
    # intentionally (outputs are bounded by max_action * tanh in [-1, 1]).
    assert jnp.allclose(out, ref, atol=3e-2, rtol=3e-2), "mismatch vs JAX reference"

    print("KERNEL_OK")
</pallas_src>

<mosaic_0001>
module attributes {stable_mosaic.version = 11 : i64} {
  func.func @_actor_kernel(%arg0: i32, %arg1: memref<1xf32, #tpu.memory_space<smem>>, %arg2: memref<104x16xf32, #tpu.memory_space<vmem>>, %arg3: memref<416x128xbf16, #tpu.memory_space<vmem>>, %arg4: memref<104x128xf32, #tpu.memory_space<vmem>>) attributes {dimension_semantics = [#tpu.dimension_semantics<parallel>], iteration_bounds = array<i64: 2>, scalar_prefetch = 1 : i64, scratch_operands = 0 : i64, tpu.core_type = #tpu.core_type<tc>, window_params = [{transform_indices = @transform_0, window_bounds = array<i64: 104, 16>}, {pipeline_mode = #tpu.pipeline_mode<synchronous>, transform_indices = @transform_1, window_bounds = array<i64: 416, 128>}, {transform_indices = @transform_2, window_bounds = array<i64: 104, 128>}]} {
    %c0 = arith.constant 0 : index
    %c0_0 = arith.constant 0 : index
    %0 = vector.load %arg3[%c0, %c0_0] : memref<416x128xbf16, #tpu.memory_space<vmem>>, vector<16x128xbf16>
    %c16 = arith.constant 16 : index
    %c0_1 = arith.constant 0 : index
    %1 = vector.load %arg3[%c16, %c0_1] : memref<416x128xbf16, #tpu.memory_space<vmem>>, vector<128x128xbf16>
    %c144 = arith.constant 144 : index
    %c0_2 = arith.constant 0 : index
    %2 = vector.load %arg3[%c144, %c0_2] : memref<416x128xbf16, #tpu.memory_space<vmem>>, vector<128x128xbf16>
    %c272 = arith.constant 272 : index
    %c0_3 = arith.constant 0 : index
    %3 = vector.load %arg3[%c272, %c0_3] : memref<416x128xbf16, #tpu.memory_space<vmem>>, vector<128x128xbf16>
    %c400 = arith.constant 400 : index
    %c0_4 = arith.constant 0 : index
    %4 = vector.load %arg3[%c400, %c0_4] : memref<416x128xbf16, #tpu.memory_space<vmem>>, vector<1x128xbf16>
    %5 = arith.extf %4 : vector<1x128xbf16> to vector<1x128xf32>
    %c401 = arith.constant 401 : index
    %c0_5 = arith.constant 0 : index
    %6 = vector.load %arg3[%c401, %c0_5] : memref<416x128xbf16, #tpu.memory_space<vmem>>, vector<1x128xbf16>
    %7 = arith.extf %6 : vector<1x128xbf16> to vector<1x128xf32>
    %c402 = arith.constant 402 : index
    %c0_6 = arith.constant 0 : index
    %8 = vector.load %arg3[%c402, %c0_6] : memref<416x128xbf16, #tpu.memory_space<vmem>>, vector<1x128xbf16>
    %9 = arith.extf %8 : vector<1x128xbf16> to vector<1x128xf32>
    %c403 = arith.constant 403 : index
    %c0_7 = arith.constant 0 : index
    %10 = vector.load %arg3[%c403, %c0_7] : memref<416x128xbf16, #tpu.memory_space<vmem>>, vector<1x128xbf16>
    %11 = arith.extf %10 : vector<1x128xbf16> to vector<1x128xf32>
    %c0_8 = arith.constant 0 : index
    %12 = memref.load %arg1[%c0_8] : memref<1xf32, #tpu.memory_space<smem>>
    %c0_9 = arith.constant 0 : index
    %c0_10 = arith.constant 0 : index
    %13 = vector.load %arg2[%c0_9, %c0_10] : memref<104x16xf32, #tpu.memory_space<vmem>>, vector<104x16xf32>
    %14 = arith.truncf %13 : vector<104x16xf32> to vector<104x16xbf16>
    %cst = arith.constant dense<0.000000e+00> : vector<104x128xf32>
    %15 = tpu.matmul %14, %0, %cst {dimension_numbers = #tpu.dot_dimension_numbers<[1], [0], [0], [1], [0, 0, 1, 1], [], []>} : vector<104x16xbf16>, vector<16x128xbf16>, vector<104x128xf32> -> vector<104x128xf32>
    %16 = vector.broadcast %5 : vector<1x128xf32> to vector<104x128xf32>
    %17 = arith.addf %15, %16 : vector<104x128xf32>
    %cst_11 = arith.constant 0.000000e+00 : f32
    %18 = vector.broadcast %cst_11 : f32 to vector<104x128xf32>
    %19 = arith.maximumf %17, %18 : vector<104x128xf32>
    %20 = arith.truncf %19 : vector<104x128xf32> to vector<104x128xbf16>
    %cst_12 = arith.constant dense<0.000000e+00> : vector<104x128xf32>
    %21 = tpu.matmul %20, %1, %cst_12 {dimension_numbers = #tpu.dot_dimension_numbers<[1], [0], [0], [1], [0, 0, 1, 1], [], []>} : vector<104x128xbf16>, vector<128x128xbf16>, vector<104x128xf32> -> vector<104x128xf32>
    %22 = vector.broadcast %7 : vector<1x128xf32> to vector<104x128xf32>
    %23 = arith.addf %21, %22 : vector<104x128xf32>
    %cst_13 = arith.constant 0.000000e+00 : f32
    %24 = vector.broadcast %cst_13 : f32 to vector<104x128xf32>
    %25 = arith.maximumf %23, %24 : vector<104x128xf32>
    %26 = arith.truncf %25 : vector<104x128xf32> to vector<104x128xbf16>
    %cst_14 = arith.constant dense<0.000000e+00> : vector<104x128xf32>
    %27 = tpu.matmul %26, %2, %cst_14 {dimension_numbers = #tpu.dot_dimension_numbers<[1], [0], [0], [1], [0, 0, 1, 1], [], []>} : vector<104x128xbf16>, vector<128x128xbf16>, vector<104x128xf32> -> vector<104x128xf32>
    %28 = vector.broadcast %9 : vector<1x128xf32> to vector<104x128xf32>
    %29 = arith.addf %27, %28 : vector<104x128xf32>
    %cst_15 = arith.constant 0.000000e+00 : f32
    %30 = vector.broadcast %cst_15 : f32 to vector<104x128xf32>
    %31 = arith.maximumf %29, %30 : vector<104x128xf32>
    %32 = arith.truncf %31 : vector<104x128xf32> to vector<104x128xbf16>
    %cst_16 = arith.constant dense<0.000000e+00> : vector<104x128xf32>
    %33 = tpu.matmul %32, %3, %cst_16 {dimension_numbers = #tpu.dot_dimension_numbers<[1], [0], [0], [1], [0, 0, 1, 1], [], []>} : vector<104x128xbf16>, vector<128x128xbf16>, vector<104x128xf32> -> vector<104x128xf32>
    %34 = vector.broadcast %11 : vector<1x128xf32> to vector<104x128xf32>
    %35 = arith.addf %33, %34 : vector<104x128xf32>
    %36 = math.tanh %35 : vector<104x128xf32>
    %37 = vector.broadcast %12 : f32 to vector<104x128xf32>
    %38 = arith.mulf %37, %36 : vector<104x128xf32>
    %c0_17 = arith.constant 0 : index
    %c0_18 = arith.constant 0 : index
    %39 = vector.load %arg4[%c0_17, %c0_18] : memref<104x128xf32, #tpu.memory_space<vmem>>, vector<104x128xf32>
    tpu.vector_store %arg4[%c0_17, %c0_18], %38 {strides = array<i32>} : memref<104x128xf32, #tpu.memory_space<vmem>>, vector<104x128xf32>,
    return
  }
  func.func @transform_0(%arg0: i32, %arg1: memref<1xf32, #tpu.memory_space<smem>>) -> (i32, i32) {
    %c0_i32 = arith.constant 0 : i32
    %c0_i32_0 = arith.constant 0 : i32
    return %arg0, %c0_i32 : i32, i32
  }
  func.func @transform_1(%arg0: i32, %arg1: memref<1xf32, #tpu.memory_space<smem>>) -> (i32, i32) {
    %c0_i32 = arith.constant 0 : i32
    %c0_i32_0 = arith.constant 0 : i32
    %c0_i32_1 = arith.constant 0 : i32
    return %c0_i32, %c0_i32_0 : i32, i32
  }
  func.func @transform_2(%arg0: i32, %arg1: memref<1xf32, #tpu.memory_space<smem>>) -> (i32, i32) {
    %c0_i32 = arith.constant 0 : i32
    %c0_i32_0 = arith.constant 0 : i32
    return %arg0, %c0_i32 : i32, i32
  }
}

</mosaic_0001>

<bundles_post_ra>
// kernel: tpu_custom_call.1
= control target key start
LH: loop header
LB: loop body
LE: loop exit
PB: predicated region body
PF: predicated region fallthrough
CT: control target
= control target key end

     0   :  { %s1370_s0 = inlined_call_operand.<no memory space> [shape: f32[1], index: 0, kind: input, shape index: {}]   ;;  %s1371_s1 = inlined_call_operand.vmem [shape: f32[200,16], index: 1, kind: input, shape index: {}]   ;;  %s1372_s2 = inlined_call_operand.vmem [shape: bf16[416,128], index: 2, kind: input, shape index: {}]   ;;  %s1373_s3 = inlined_call_operand.hbm [shape: f32[200,128], index: 3, kind: output, shape index: {}]  }
   0x1   :  { %8 = sst [smem:[#allocation3]] %s1370_s0 }
   0x2   :  { %9 = vsyncpa [#allocation5], 0 }
   0x3   :  { %11 = vsyncpa [#allocation5 + $0x1], 0  ;;  %s1093_s14 = smov 0   ;;  %s1095_s15 = smov 0  }
   0x4   :  { %s1097_s16 = smov 0   ;;  %s1099_s17 = smov 0  }
   0x5 LB: > { %s1114_s0 = sadd.s32 4294967295, %s1065_s17   ;;  %s780_s18 = sadd.s32 4294967294, %s1065_s17   ;;  %s1065_s17 = sphi %s1099_s17, %s1380_s17   ;;  %s1061_s16 = sphi %s1097_s16, %s1379_s16   ;;  %s1057_s15 = sphi %s1095_s15, %s1378_s15   ;;  %s1053_s14 = sphi %s1093_s14, %s1377_s14  }
   0x6   : > { %s1118_s19 = sadd.s32 1, %s1065_s17   ;;  %s71_s20 = sadd.s32 1, %s1061_s16 }
   0x7   : > { %s68_s21 = ssub.s32 %s1065_s17, %s1118_s19  ;;  %p81_p0 = scmp.ne.s32.totalorder %s1061_s16, %s1057_s15 }
   0x8   : > { %p69_p1 = scmp.eq.s32.totalorder %s68_s21, 0  ;;  %p82_p2 = scmp.eq.s32.totalorder %s1114_s0, 1 }
   0x9   : > { %p87_p3 = scmp.ne.s32.totalorder %s1057_s15, %s1053_s14  ;;  %p88_p4 = scmp.eq.s32.totalorder %s780_s18, 1 }
   0xa   : > { %s1129_s22 = scalar_select %p69_p1, %s1061_s16, %s71_s20  }
   0xb   : > { %p1131_p5 = por %p82_p2, %p81_p0  ;;  %p1135_p6 = por %p88_p4, %p87_p3 }
   0xc   : > { %p783_p7 = scmp.ge.s32.totalorder %s1065_s17, 1  ;;  %p126_p8 = scmp.lt.s32.totalorder %s1065_s17, 3 }
   0xe   : > { %p127_p9 = pnand %p783_p7, %p126_p8 }
   0xf   : > { %s1145_s27 = smul.u32 (!%p127_p9), 13, %s1114_s0  ;;  %s149_s4 = sand.u32 (!%p127_p9), 1, %s1057_s15  }
  0x10   : > { %130 = sbr.rel (%p127_p9) target bundleno = 725 (0x2d5), region = 28  ;;  %s1309_s8 = scalar_lea.sflag (!%p127_p9), [#allocation5], %s149_s4 }
  0x11   : > { %p157_p10 = scmp.lt.s32.totalorder (!%p127_p9), %s1145_s27, 24  ;;  %s925_s6 = smul.u32 (!%p127_p9), 104, %s149_s4 }
  0x13   : > { %s1269_s7 = scalar_lea.vmem (!%p127_p9), [#allocation4], %s925_s6 }
  0x15   : > { %v899_v0 = vld [vmem:[%s1372_s2] sm:$0xff]  ;;  %s158_s28 = scalar_select %p157_p10, %s1145_s27, 24  ;;  %vm254_vm0 = vcmask 130048   ;;  %v906_v17 = vld [vmem:[%s1372_s2 + $0x38] sm:$0xff]  ;;  %v905_v18 = vld [vmem:[%s1372_s2 + $0x30] sm:$0xff] }
  0x16   : > { %283 = vmatpush.bf16.msra.mxu0 %v899_v0  ;;  %v907_v13 = vld [vmem:[%s1372_s2 + $0x40] sm:$0xff]  ;;  %v904_v19 = vld [vmem:[%s1372_s2 + $0x28] sm:$0xff]  ;;  %v902_v26 = vld [vmem:[%s1372_s2 + $0x18] sm:$0xff]  ;;  %s704_s9 = ssub.s32 (%p1131_p5), 25, %s1145_s27 }
  0x17   : > { %s784_s29 = sshll.u32 %s158_s28, 3  ;;  %388 = vmatpush.bf16.msra.mxu1 %v907_v13  ;;  %v903_v24 = vld [vmem:[%s1372_s2 + $0x20] sm:$0xff]  ;;  %v901_v27 = vld [vmem:[%s1372_s2 + $0x10] sm:$0xff]  ;;  %v900_v28 = vld [vmem:[%s1372_s2 + $0x8] sm:$0xff]  ;;  %p705_p11 = scmp.lt.s32.totalorder (%p1131_p5), %s704_s9, 13 }
  0x18   : > { %s1152_s5 = scalar_lea.vmem %s1371_s1, %s784_s29  ;;  %v1201_v29 = vld [vmem:[%s1372_s2 + $0xc8] sm:$0x1] }
  0x19   : > { %v227_v1 = vld [vmem:[%s1152_s5] sm:$0xff]  ;;  %v228_v2 = vld [vmem:[%s1152_s5 + $0x8] sm:$0xff]  ;;  %v229_v4 = vld [vmem:[%s1152_s5 + $0x10] sm:$0xff]  ;;  %v223_v30 = vunpack.c.l.bf16 %v1201_v29 }
  0x1a   : > { %v240_v3 = vpack.c.bf16 %v228_v2, %v227_v1  ;;  %v230_v5 = vld [vmem:[%s1152_s5 + $0x18] sm:$0xff]  ;;  %v231_v7 = vld [vmem:[%s1152_s5 + $0x20] sm:$0xff]  ;;  %v232_v8 = vld [vmem:[%s1152_s5 + $0x28] sm:$0xff] }
  0x1b   : > { %v241_v6 = vpack.c.bf16 %v230_v5, %v229_v4  ;;  %v242_v9 = vpack.c.bf16 %v232_v8, %v231_v7  ;;  %v233_v10 = vld [vmem:[%s1152_s5 + $0x30] sm:$0xff]  ;;  %v234_v11 = vld [vmem:[%s1152_s5 + $0x38] sm:$0xff]  ;;  %v235_v14 = vld [vmem:[%s1152_s5 + $0x40] sm:$0xff]  ;;  %389 = vmatpush.bf16.msra.mxu1 %v906_v17  ;;  %v247_v32 = vperm.slane %v223_v30, 0 }
  0x1c   : > { %789 = vmatmul.msk.bf16.vlgmr.msra.gmra.mxu0 %vm254_vm0, %v240_v3  ;;  %v243_v12 = vpack.c.bf16 %v234_v11, %v233_v10  ;;  %v236_v15 = vld [vmem:[%s1152_s5 + $0x48] sm:$0xff]  ;;  %v237_v20 = vld [vmem:[%s1152_s5 + $0x50] sm:$0xff]  ;;  %v238_v21 = vld [vmem:[%s1152_s5 + $0x58] sm:$0xff] }
  0x1d   : > { %v244_v16 = vpack.c.bf16 %v236_v15, %v235_v14  ;;  %v245_v22 = vpack.c.bf16 %v238_v21, %v237_v20  ;;  %v239_v23 = vld [vmem:[%s1152_s5 + $0x60] sm:$0xff]  ;;  %v914_v5 = vld [vmem:[%s1372_s2 + $0x78] sm:$0xff]  ;;  %v912_v10 = vld [vmem:[%s1372_s2 + $0x68] sm:$0xff]  ;;  %s226_s5 = sld [smem:[#allocation3]] }
  0x1e   : > { %v246_v25 = vpack.c.bf16 %v239_v23, %v239_v23  ;;  %v915_v3 = vld [vmem:[%s1372_s2 + $0x80] sm:$0xff]  ;;  %v910_v20 = vld [vmem:[%s1372_s2 + $0x58] sm:$0xff]  ;;  %v909_v21 = vld [vmem:[%s1372_s2 + $0x50] sm:$0xff] }
  0x1f   : > { %390 = vmatpush.bf16.msra.mxu1 %v905_v18  ;;  %500 = vmatpush.bf16.msra.mxu2 %v915_v3  ;;  %v911_v18 = vld [vmem:[%s1372_s2 + $0x60] sm:$0xff] }
  0x23   : > { %391 = vmatpush.bf16.msra.mxu1 %v904_v19  ;;  %501 = vmatpush.bf16.msra.mxu2 %v914_v5 }
  0x27   : > { %392 = vmatpush.bf16.msra.mxu1 %v903_v24  ;;  %v339_v24 = vperm.slane %v223_v30, 1 }
  0x2b   : > { %393 = vmatpush.bf16.msra.mxu1 %v902_v26 }
  0x2c   : > { %790 = vmatmul.msk.bf16.gmra.mxu0 %vm254_vm0, %v241_v6  ;;  %v913_v6 = vld [vmem:[%s1372_s2 + $0x70] sm:$0xff] }
  0x2d   : > { %502 = vmatpush.bf16.msra.mxu2 %v913_v6 }
  0x2f   : > { %394 = vmatpush.bf16.msra.mxu1 %v901_v27 }
  0x31   : > { %503 = vmatpush.bf16.msra.mxu2 %v912_v10 }
  0x33   : > { %395 = vmatpush.bf16.msra.mxu1 %v900_v28 }
  0x35   : > { %504 = vmatpush.bf16.msra.mxu2 %v911_v18 }
  0x39   : > { %505 = vmatpush.bf16.msra.mxu2 %v910_v20 }
  0x3c   : > { %791 = vmatmul.msk.bf16.gmra.mxu0 %vm254_vm0, %v242_v9 }
  0x3d   : > { %506 = vmatpush.bf16.msra.mxu2 %v909_v21 }
  0x4c   : > { %792 = vmatmul.msk.bf16.gmra.mxu0 %vm254_vm0, %v243_v12 }
  0x5c   : > { %793 = vmatmul.msk.bf16.gmra.mxu0 %vm254_vm0, %v244_v16 }
  0x6c   : > { %794 = vmatmul.msk.bf16.gmra.mxu0 %vm254_vm0, %v245_v22  ;;  %v908_v22 = vld [vmem:[%s1372_s2 + $0x48] sm:$0xff] }
  0x6d   : > { %507 = vmatpush.bf16.msra.mxu2 %v908_v22 }
  0x7c   : > { %795 = vmatmul.msk.bf16.gmra.mxu0 %vm254_vm0, %v246_v25 }
  0x99   : > { %v285_v31 = vpop.f32.mrf.mxu0 }
  0x9a   : > { %v286_v33 = vadd.f32 %v285_v31, %v247_v32 }
  0x9c   : > { %v319_v36 = vmax.f32 %v286_v33, 0.0 }
  0xa1   : > { %v287_v34 = vpop.f32.mrf.mxu0 }
  0xa2   : > { %v288_v35 = vadd.f32 %v287_v34, %v247_v32 }
  0xa4   : > { %v320_v37 = vmax.f32 %v288_v35, 0.0 }
  0xa6   : > { %v332_v38 = vpack.c.bf16 %v320_v37, %v319_v36 }
  0xa8   : > { %396 = vmatmul.bf16.vlgmr.msra.gmra.mxu1 %v332_v38 }
  0xa9   : > { %v290_v39 = vpop.f32.mrf.mxu0 }
  0xaa   : > { %v291_v40 = vadd.f32 %v290_v39, %v247_v32 }
  0xac   : > { %v321_v43 = vmax.f32 %v291_v40, 0.0 }
  0xb1   : > { %v292_v41 = vpop.f32.mrf.mxu0 }
  0xb2   : > { %v293_v42 = vadd.f32 %v292_v41, %v247_v32 }
  0xb4   : > { %v322_v44 = vmax.f32 %v293_v42, 0.0 }
  0xb6   : > { %v333_v45 = vpack.c.bf16 %v322_v44, %v321_v43 }
  0xb8   : > { %401 = vmatmul.bf16.gmra.mxu1 %v333_v45 }
  0xb9   : > { %v295_v46 = vpop.f32.mrf.mxu0 }
  0xba   : > { %v296_v47 = vadd.f32 %v295_v46, %v247_v32 }
  0xbc   : > { %v323_v50 = vmax.f32 %v296_v47, 0.0 }
  0xc1   : > { %v297_v48 = vpop.f32.mrf.mxu0 }
  0xc2   : > { %v298_v49 = vadd.f32 %v297_v48, %v247_v32 }
  0xc4   : > { %v324_v51 = vmax.f32 %v298_v49, 0.0 }
  0xc6   : > { %v334_v52 = vpack.c.bf16 %v324_v51, %v323_v50 }
  0xc8   : > { %406 = vmatmul.bf16.gmra.mxu1 %v334_v52 }
  0xc9   : > { %v300_v53 = vpop.f32.mrf.mxu0 }
  0xca   : > { %v301_v54 = vadd.f32 %v300_v53, %v247_v32 }
  0xcc   : > { %v325_v57 = vmax.f32 %v301_v54, 0.0 }
  0xd1   : > { %v302_v55 = vpop.f32.mrf.mxu0 }
  0xd2   : > { %v303_v56 = vadd.f32 %v302_v55, %v247_v32 }
  0xd4   : > { %v326_v58 = vmax.f32 %v303_v56, 0.0 }
  0xd6   : > { %v335_v59 = vpack.c.bf16 %v326_v58, %v325_v57 }
  0xd8   : > { %411 = vmatmul.bf16.gmra.mxu1 %v335_v59  ;;  %v923_v59 = vld [vmem:[%s1372_s2 + $0xc0] sm:$0xff] }
  0xd9   : > { %v305_v60 = vpop.f32.mrf.mxu0  ;;  %612 = vmatpush.bf16.msra.mxu3 %v923_v59 }
  0xda   : > { %v306_v61 = vadd.f32 %v305_v60, %v247_v32 }
  0xdc   : > { %v327_v0 = vmax.f32 %v306_v61, 0.0  ;;  %v922_v61 = vld [vmem:[%s1372_s2 + $0xb8] sm:$0xff] }
  0xdd   : > { %613 = vmatpush.bf16.msra.mxu3 %v922_v61 }
  0xe1   : > { %v307_v62 = vpop.f32.mrf.mxu0 }
  0xe2   : > { %v308_v63 = vadd.f32 %v307_v62, %v247_v32  ;;  %v921_v62 = vld [vmem:[%s1372_s2 + $0xb0] sm:$0xff] }
  0xe3   : > { %614 = vmatpush.bf16.msra.mxu3 %v921_v62 }
  0xe4   : > { %v328_v1 = vmax.f32 %v308_v63, 0.0 }
  0xe6   : > { %v336_v2 = vpack.c.bf16 %v328_v1, %v327_v0 }
  0xe8   : > { %416 = vmatmul.bf16.gmra.mxu1 %v336_v2  ;;  %v920_v2 = vld [vmem:[%s1372_s2 + $0xa8] sm:$0xff] }
  0xe9   : > { %v310_v4 = vpop.f32.mrf.mxu0  ;;  %615 = vmatpush.bf16.msra.mxu3 %v920_v2 }
  0xea   : > { %v311_v7 = vadd.f32 %v310_v4, %v247_v32 }
  0xec   : > { %v329_v11 = vmax.f32 %v311_v7, 0.0 }
  0xf1   : > { %v312_v8 = vpop.f32.mrf.mxu0 }
  0xf2   : > { %v313_v9 = vadd.f32 %v312_v8, %v247_v32 }
  0xf4   : > { %v330_v12 = vmax.f32 %v313_v9, 0.0 }
  0xf6   : > { %v337_v13 = vpack.c.bf16 %v330_v12, %v329_v11  ;;  %v919_v11 = vld [vmem:[%s1372_s2 + $0xa0] sm:$0xff]  ;;  %v918_v12 = vld [vmem:[%s1372_s2 + $0x98] sm:$0xff] }
  0xf7   : > { %616 = vmatpush.bf16.msra.mxu3 %v919_v11 }
  0xf8   : > { %421 = vmatmul.bf16.gmra.mxu1 %v337_v13  ;;  %v917_v13 = vld [vmem:[%s1372_s2 + $0x90] sm:$0xff] }
  0xf9   : > { %v315_v14 = vpop.f32.mrf.mxu0 }
  0xfa   : > { %v316_v15 = vadd.f32 %v315_v14, %v247_v32  ;;  %v916_v14 = vld [vmem:[%s1372_s2 + $0x88] sm:$0xff] }
  0xfb   : > { %617 = vmatpush.bf16.msra.mxu3 %v918_v12 }
  0xfc   : > { %v331_v16 = vmax.f32 %v316_v15, 0.0  ;;  %v224_v15 = vld [vmem:[%s1372_s2 + $0xc8] sm:$0x2] }
  0xfe   : > { %v338_v19 = vpack.c.bf16 %v331_v16, %v331_v16  ;;  %v225_v16 = vunpack.c.l.bf16 %v224_v15 }
  0xff   : > { %618 = vmatpush.bf16.msra.mxu3 %v917_v13 }
 0x100   : > { %v451_v18 = vperm.slane %v225_v16, 2 }
 0x101   : > { %v317_v17 = vpop.f32.mrf.mxu0 }
 0x103   : > { %619 = vmatpush.bf16.msra.mxu3 %v916_v14 }
 0x108   : > { %426 = vmatmul.bf16.gmra.mxu1 %v338_v19 }
 0x125   : > { %v397_v23 = vpop.f32.mrf.mxu1 }
 0x126   : > { %v398_v25 = vadd.f32 %v397_v23, %v339_v24 }
 0x128   : > { %v431_v28 = vmax.f32 %v398_v25, 0.0 }
 0x12d   : > { %v399_v26 = vpop.f32.mrf.mxu1 }
 0x12e   : > { %v400_v27 = vadd.f32 %v399_v26, %v339_v24 }
 0x130   : > { %v432_v31 = vmax.f32 %v400_v27, 0.0 }
 0x132   : > { %v444_v32 = vpack.c.bf16 %v432_v31, %v431_v28 }
 0x134   : > { %508 = vmatmul.bf16.vlgmr.msra.gmra.mxu2 %v444_v32 }
 0x135   : > { %v402_v33 = vpop.f32.mrf.mxu1 }
 0x136   : > { %v403_v34 = vadd.f32 %v402_v33, %v339_v24 }
 0x138   : > { %v433_v37 = vmax.f32 %v403_v34, 0.0 }
 0x13d   : > { %v404_v35 = vpop.f32.mrf.mxu1 }
 0x13e   : > { %v405_v36 = vadd.f32 %v404_v35, %v339_v24 }
 0x140   : > { %v434_v38 = vmax.f32 %v405_v36, 0.0 }
 0x142   : > { %v445_v39 = vpack.c.bf16 %v434_v38, %v433_v37 }
 0x144   : > { %513 = vmatmul.bf16.gmra.mxu2 %v445_v39 }
 0x145   : > { %v407_v40 = vpop.f32.mrf.mxu1 }
 0x146   : > { %v408_v41 = vadd.f32 %v407_v40, %v339_v24 }
 0x148   : > { %v435_v30 = vmax.f32 %v408_v41, 0.0 }
 0x14d   : > { %v409_v42 = vpop.f32.mrf.mxu1 }
 0x14e   : > { %v410_v29 = vadd.f32 %v409_v42, %v339_v24 }
 0x150   : > { %v436_v43 = vmax.f32 %v410_v29, 0.0 }
 0x152   : > { %v446_v44 = vpack.c.bf16 %v436_v43, %v435_v30 }
 0x154   : > { %518 = vmatmul.bf16.gmra.mxu2 %v446_v44 }
 0x155   : > { %v412_v45 = vpop.f32.mrf.mxu1 }
 0x156   : > { %v413_v46 = vadd.f32 %v412_v45, %v339_v24 }
 0x158   : > { %v437_v49 = vmax.f32 %v413_v46, 0.0 }
 0x15d   : > { %v414_v47 = vpop.f32.mrf.mxu1 }
 0x15e   : > { %v415_v48 = vadd.f32 %v414_v47, %v339_v24 }
 0x160   : > { %v438_v50 = vmax.f32 %v415_v48, 0.0 }
 0x162   : > { %v447_v51 = vpack.c.bf16 %v438_v50, %v437_v49 }
 0x164   : > { %523 = vmatmul.bf16.gmra.mxu2 %v447_v51 }
 0x165   : > { %v417_v52 = vpop.f32.mrf.mxu1 }
 0x166   : > { %v418_v53 = vadd.f32 %v417_v52, %v339_v24 }
 0x168   : > { %v439_v56 = vmax.f32 %v418_v53, 0.0 }
 0x16d   : > { %v419_v54 = vpop.f32.mrf.mxu1 }
 0x16e   : > { %v420_v55 = vadd.f32 %v419_v54, %v339_v24 }
 0x170   : > { %v440_v57 = vmax.f32 %v420_v55, 0.0 }
 0x172   : > { %v448_v58 = vpack.c.bf16 %v440_v57, %v439_v56 }
 0x174   : > { %528 = vmatmul.bf16.gmra.mxu2 %v448_v58 }
 0x175   : > { %v422_v60 = vpop.f32.mrf.mxu1 }
 0x176   : > { %v423_v63 = vadd.f32 %v422_v60, %v339_v24 }
 0x178   : > { %v441_v3 = vmax.f32 %v423_v63, 0.0 }
 0x17d   : > { %v424_v0 = vpop.f32.mrf.mxu1 }
 0x17e   : > { %v425_v1 = vadd.f32 %v424_v0, %v339_v24 }
 0x180   : > { %v442_v4 = vmax.f32 %v425_v1, 0.0  ;;  %v1260_v1 = vperm.slane %v225_v16, 3 }
 0x182   : > { %v449_v5 = vpack.c.bf16 %v442_v4, %v441_v3  ;;  %v1265_v4 = vstv %s226_s5 }
 0x184   : > { %533 = vmatmul.bf16.gmra.mxu2 %v449_v5 }
 0x185   : > { %v427_v6 = vpop.f32.mrf.mxu1 }
 0x186   : > { %v428_v7 = vadd.f32 %v427_v6, %v339_v24 }
 0x188   : > { %v443_v8 = vmax.f32 %v428_v7, 0.0 }
 0x18a   : > { %v450_v10 = vpack.c.bf16 %v443_v8, %v443_v8 }
 0x18d   : > { %v429_v9 = vpop.f32.mrf.mxu1 }
 0x194   : > { %538 = vmatmul.bf16.gmra.mxu2 %v450_v10 }
 0x1b7   : > { %v509_v17 = vpop.f32.mrf.mxu2 }
 0x1b8   : > { %v510_v19 = vadd.f32 %v509_v17, %v451_v18 }
 0x1ba   : > { %v543_v22 = vmax.f32 %v510_v19, 0.0 }
 0x1bf   : > { %v511_v20 = vpop.f32.mrf.mxu2 }
 0x1c0   : > { %v512_v21 = vadd.f32 %v511_v20, %v451_v18 }
 0x1c2   : > { %v544_v23 = vmax.f32 %v512_v21, 0.0 }
 0x1c4   : > { %v556_v24 = vpack.c.bf16 %v544_v23, %v543_v22 }
 0x1c6   : > { %620 = vmatmul.bf16.vlgmr.msra.gmra.mxu3 %v556_v24 }
 0x1c7   : > { %v514_v25 = vpop.f32.mrf.mxu2 }
 0x1c8   : > { %v515_v26 = vadd.f32 %v514_v25, %v451_v18 }
 0x1ca   : > { %v545_v31 = vmax.f32 %v515_v26, 0.0 }
 0x1cf   : > { %v516_v27 = vpop.f32.mrf.mxu2 }
 0x1d0   : > { %v517_v28 = vadd.f32 %v516_v27, %v451_v18 }
 0x1d2   : > { %v546_v32 = vmax.f32 %v517_v28, 0.0 }
 0x1d4   : > { %v557_v33 = vpack.c.bf16 %v546_v32, %v545_v31 }
 0x1d6   : > { %625 = vmatmul.bf16.gmra.mxu3 %v557_v33 }
 0x1d7   : > { %v519_v34 = vpop.f32.mrf.mxu2 }
 0x1d8   : > { %v520_v35 = vadd.f32 %v519_v34, %v451_v18 }
 0x1da   : > { %v547_v38 = vmax.f32 %v520_v35, 0.0 }
 0x1df   : > { %v521_v36 = vpop.f32.mrf.mxu2 }
 0x1e0   : > { %v522_v37 = vadd.f32 %v521_v36, %v451_v18 }
 0x1e2   : > { %v548_v39 = vmax.f32 %v522_v37, 0.0 }
 0x1e4   : > { %v558_v40 = vpack.c.bf16 %v548_v39, %v547_v38 }
 0x1e6   : > { %630 = vmatmul.bf16.gmra.mxu3 %v558_v40 }
 0x1e7   : > { %v524_v41 = vpop.f32.mrf.mxu2 }
 0x1e8   : > { %v525_v42 = vadd.f32 %v524_v41, %v451_v18 }
 0x1ea   : > { %v549_v43 = vmax.f32 %v525_v42, 0.0 }
 0x1ef   : > { %v526_v29 = vpop.f32.mrf.mxu2 }
 0x1f0   : > { %v527_v30 = vadd.f32 %v526_v29, %v451_v18 }
 0x1f2   : > { %v550_v44 = vmax.f32 %v527_v30, 0.0 }
 0x1f4   : > { %v559_v45 = vpack.c.bf16 %v550_v44, %v549_v43 }
 0x1f6   : > { %635 = vmatmul.bf16.gmra.mxu3 %v559_v45 }
 0x1f7   : > { %v529_v46 = vpop.f32.mrf.mxu2 }
 0x1f8   : > { %v530_v47 = vadd.f32 %v529_v46, %v451_v18 }
 0x1fa   : > { %v551_v50 = vmax.f32 %v530_v47, 0.0 }
 0x1ff   : > { %v531_v48 = vpop.f32.mrf.mxu2 }
 0x200   : > { %v532_v49 = vadd.f32 %v531_v48, %v451_v18 }
 0x202   : > { %v552_v51 = vmax.f32 %v532_v49, 0.0 }
 0x204   : > { %v560_v52 = vpack.c.bf16 %v552_v51, %v551_v50 }
 0x206   : > { %640 = vmatmul.bf16.gmra.mxu3 %v560_v52 }
 0x207   : > { %v534_v53 = vpop.f32.mrf.mxu2 }
 0x208   : > { %v535_v54 = vadd.f32 %v534_v53, %v451_v18 }
 0x20a   : > { %v553_v57 = vmax.f32 %v535_v54, 0.0 }
 0x20f   : > { %v536_v55 = vpop.f32.mrf.mxu2 }
 0x210   : > { %v537_v56 = vadd.f32 %v536_v55, %v451_v18 }
 0x212   : > { %v554_v58 = vmax.f32 %v537_v56, 0.0 }
 0x214   : > { %v561_v59 = vpack.c.bf16 %v554_v58, %v553_v57 }
 0x216   : > { %645 = vmatmul.bf16.gmra.mxu3 %v561_v59 }
 0x217   : > { %v539_v60 = vpop.f32.mrf.mxu2 }
 0x218   : > { %v540_v61 = vadd.f32 %v539_v60, %v451_v18 }
 0x21a   : > { %v555_v62 = vmax.f32 %v540_v61, 0.0 }
 0x21c   : > { %v562_v0 = vpack.c.bf16 %v555_v62, %v555_v62 }
 0x21f   : > { %v541_v63 = vpop.f32.mrf.mxu2 }
 0x226   : > { %650 = vmatmul.bf16.gmra.mxu3 %v562_v0 }
 0x249   : > { %v621_v2 = vpop.f32.mrf.mxu3 }
 0x24a   : > { %v622_v3 = vadd.f32 %v621_v2, %v1260_v1 }
 0x24c   : > { %966 = vtanh.f32 %v622_v3 }
 0x251   : > { %v623_v5 = vpop.f32.mrf.mxu3 }
 0x252   : > { %v967_v6 = vpop.eup %966  ;;  %v624_v7 = vadd.f32 %v623_v5, %v1260_v1 }
 0x253   : > { %v669_v8 = vmul.f32 %v967_v6, %v1265_v4 }
 0x254   : > { %968 = vtanh.f32 %v624_v7 }
 0x255   : > { %682 = vst [vmem:[%s1269_s7] sm:$0xff] %v669_v8 }
 0x259   : > { %v626_v9 = vpop.f32.mrf.mxu3 }
 0x25a   : > { %v969_v10 = vpop.eup %968  ;;  %v627_v11 = vadd.f32 %v626_v9, %v1260_v1 }
 0x25b   : > { %v670_v12 = vmul.f32 %v969_v10, %v1265_v4 }
 0x25c   : > { %970 = vtanh.f32 %v627_v11 }
 0x25d   : > { %683 = vst [vmem:[%s1269_s7 + $0x8] sm:$0xff] %v670_v12 }
 0x261   : > { %v628_v13 = vpop.f32.mrf.mxu3 }
 0x262   : > { %v971_v14 = vpop.eup %970  ;;  %v629_v15 = vadd.f32 %v628_v13, %v1260_v1 }
 0x263   : > { %v671_v16 = vmul.f32 %v971_v14, %v1265_v4 }
 0x264   : > { %972 = vtanh.f32 %v629_v15 }
 0x265   : > { %684 = vst [vmem:[%s1269_s7 + $0x10] sm:$0xff] %v671_v16 }
 0x269   : > { %v631_v17 = vpop.f32.mrf.mxu3 }
 0x26a   : > { %v973_v18 = vpop.eup %972  ;;  %v632_v19 = vadd.f32 %v631_v17, %v1260_v1 }
 0x26b   : > { %v672_v20 = vmul.f32 %v973_v18, %v1265_v4 }
 0x26c   : > { %974 = vtanh.f32 %v632_v19 }
 0x26d   : > { %685 = vst [vmem:[%s1269_s7 + $0x18] sm:$0xff] %v672_v20 }
 0x271   : > { %v633_v21 = vpop.f32.mrf.mxu3 }
 0x272   : > { %v975_v22 = vpop.eup %974  ;;  %v634_v23 = vadd.f32 %v633_v21, %v1260_v1 }
 0x273   : > { %v673_v24 = vmul.f32 %v975_v22, %v1265_v4 }
 0x274   : > { %976 = vtanh.f32 %v634_v23 }
 0x275   : > { %686 = vst [vmem:[%s1269_s7 + $0x20] sm:$0xff] %v673_v24 }
 0x279   : > { %v636_v25 = vpop.f32.mrf.mxu3 }
 0x27a   : > { %v977_v26 = vpop.eup %976  ;;  %v637_v27 = vadd.f32 %v636_v25, %v1260_v1 }
 0x27b   : > { %v674_v28 = vmul.f32 %v977_v26, %v1265_v4 }
 0x27c   : > { %978 = vtanh.f32 %v637_v27 }
 0x27d   : > { %687 = vst [vmem:[%s1269_s7 + $0x28] sm:$0xff] %v674_v28 }
 0x281   : > { %v638_v31 = vpop.f32.mrf.mxu3 }
 0x282   : > { %v979_v32 = vpop.eup %978  ;;  %v639_v33 = vadd.f32 %v638_v31, %v1260_v1 }
 0x283   : > { %v675_v34 = vmul.f32 %v979_v32, %v1265_v4 }
 0x284   : > { %980 = vtanh.f32 %v639_v33 }
 0x285   : > { %688 = vst [vmem:[%s1269_s7 + $0x30] sm:$0xff] %v675_v34 }
 0x289   : > { %v641_v35 = vpop.f32.mrf.mxu3 }
 0x28a   : > { %v981_v36 = vpop.eup %980  ;;  %v642_v37 = vadd.f32 %v641_v35, %v1260_v1 }
 0x28b   : > { %v676_v38 = vmul.f32 %v981_v36, %v1265_v4 }
 0x28c   : > { %982 = vtanh.f32 %v642_v37 }
 0x28d   : > { %689 = vst [vmem:[%s1269_s7 + $0x38] sm:$0xff] %v676_v38 }
 0x291   : > { %v643_v39 = vpop.f32.mrf.mxu3 }
 0x292   : > { %v983_v40 = vpop.eup %982  ;;  %v644_v41 = vadd.f32 %v643_v39, %v1260_v1 }
 0x293   : > { %v677_v42 = vmul.f32 %v983_v40, %v1265_v4 }
 0x294   : > { %984 = vtanh.f32 %v644_v41 }
 0x295   : > { %690 = vst [vmem:[%s1269_s7 + $0x40] sm:$0xff] %v677_v42 }
 0x299   : > { %v646_v29 = vpop.f32.mrf.mxu3 }
 0x29a   : > { %v985_v30 = vpop.eup %984  ;;  %v647_v43 = vadd.f32 %v646_v29, %v1260_v1 }
 0x29b   : > { %v678_v44 = vmul.f32 %v985_v30, %v1265_v4 }
 0x29c   : > { %986 = vtanh.f32 %v647_v43 }
 0x29d   : > { %691 = vst [vmem:[%s1269_s7 + $0x48] sm:$0xff] %v678_v44 }
 0x2a1   : > { %v648_v45 = vpop.f32.mrf.mxu3 }
 0x2a2   : > { %v987_v46 = vpop.eup %986  ;;  %v649_v47 = vadd.f32 %v648_v45, %v1260_v1 }
 0x2a3   : > { %v679_v48 = vmul.f32 %v987_v46, %v1265_v4 }
 0x2a4   : > { %988 = vtanh.f32 %v649_v47 }
 0x2a5   : > { %692 = vst [vmem:[%s1269_s7 + $0x50] sm:$0xff] %v679_v48 }
 0x2a9   : > { %v651_v49 = vpop.f32.mrf.mxu3 }
 0x2aa   : > { %v989_v50 = vpop.eup %988  ;;  %v652_v51 = vadd.f32 %v651_v49, %v1260_v1 }
 0x2ab   : > { %v680_v52 = vmul.f32 %v989_v50, %v1265_v4 }
 0x2ac   : > { %990 = vtanh.f32 %v652_v51 }
 0x2ad   : > { %693 = vst [vmem:[%s1269_s7 + $0x58] sm:$0xff] %v680_v52 }
 0x2b1   : > { %v653_v53 = vpop.f32.mrf.mxu3  ;;  %702 = sbr.rel (!%p1131_p5) target bundleno = 725 (0x2d5), region = 32 }
 0x2b2   : > { %v991_v54 = vpop.eup %990 }
 0x2b3   : > { %v681_v55 = vmul.f32 %v991_v54, %v1265_v4 }
 0x2b5   : > { %694 = vst [vmem:[%s1269_s7 + $0x60] sm:$0xff] %v681_v55 }
 0x2b6   : > { %s1382_s9 = smov (!%p705_p11, %s704_s9), 13 }
 0x2b7   : > { %s892_s10 = sshll.u32 %s1382_s9, 3 }
 0x2b8   : > { %s708_s11 = ssub.s32 104, %s892_s10 }
 0x2b9   : > { %s709_s12 = sshll.u32 %s708_s11, 4 }
 0x2ba   : > { %710 = vsyncadd %s1309_s8, %s709_s12  ;;  %p1318_p12 = scmp.ne.s32.totalorder %s892_s10, 0  ;;  %s924_s23 = smul.u32 104, %s1114_s0 }
 0x2bb   : > { %s715_s18 = sshll.u32 %s1269_s7, 4  ;;  %s896_s27 = sshll.u32 %s1382_s9, 7  ;;  %s1328_s18 = int_to_ptr.vmem [resolvable:$true] %s715_s18 }
 0x2bc   : > { %s713_s25 = scalar_lea.hbm %s1373_s3, %s924_s23  ;;  %s992_s28 = sshra.s32 %s1328_s18, 4  ;;  %s993_s28 = int_to_ptr.vmem [resolvable:$true] %s992_s28 }
 0x2bd   : > { %s717_s26 = sshll.u32 %s713_s25, 4  ;;  %s994_s29 = sshrl.u32 %s896_s27, 4  ;;  %s1330_s26 = int_to_ptr.hbm [resolvable:$true] %s717_s26 }
 0x2be   : > { %s999_s30 = scalar_lea.vmem %s993_s28, %s994_s29  ;;  %s1067_s0 = smov [#allocation4]  }
 0x2bf   : > { %p1000_p13 = scmp.ne.s32.totalorder %s993_s28, %s999_s30  ;;  %s1003_s4 = scalar_lea.vmem %s1067_s0, 208 }
 0x2c0   : > { %p1005_p2 = scmp.lt.s32.totalorder %s1003_s4, %s999_s30 }
 0x2c1   : > { %p1001_p0 = pnand %p1000_p13, %p1318_p12 }
 0x2c3   : > { %p1002_p1 = pneg %p1001_p0 }
 0x2c5   : > { %p1007_p3 = pnand %p1005_p2, %p1002_p1 }
 0x2c7   : > { %1010 = shalt.err (!%p1007_p3)
}
 0x2c8   : > { %s1011_s5 = sshra.s32 %s1330_s26, 4  ;;  %s1022_s11 = scalar_lea.hbm %s1373_s3, 200  ;;  %s1012_s5 = int_to_ptr.hbm [resolvable:$true] %s1011_s5 }
 0x2c9   : > { %s1018_s6 = scalar_lea.hbm %s1012_s5, %s994_s29  ;;  %p1023_p8 = scmp.lt.s32.totalorder %s1012_s5, %s1373_s3 }
 0x2ca   : > { %p1019_p4 = scmp.ne.s32.totalorder %s1012_s5, %s1018_s6  ;;  %p1024_p9 = scmp.lt.s32.totalorder %s1022_s11, %s1018_s6 }
 0x2cc   : > { %p1020_p5 = pnand %p1019_p4, %p1318_p12  ;;  %p1025_p10 = por %p1024_p9, %p1023_p8 }
 0x2ce   : > { %p1021_p7 = pneg %p1020_p5 }
 0x2d0   : > { %p1026_p11 = pnand %p1025_p10, %p1021_p7 }
 0x2d2   : > { %1029 = shalt.err (!%p1026_p11)
}
 0x2d3   : > { %s1068_s20 = smov 128   ;;  %s1069_s21 = smov 8  }
 0x2d4   : > { %723 = dma.vmem_to_hbm [thread:$0]  (%p1318_p12), %s1328_s18, %s896_s27, %s1330_s26, %s1309_s8, %s1068_s20, %s1068_s20, %s1069_s21  }
 0x2d5 PF: > { %p931_p13 = scmp.ge.s32.totalorder %s1065_s17, 2  ;;  %s732_s25 = sand.u32 1, %s1053_s14  }
 0x2d6   : > { %s733_s28 = scalar_lea.sflag [#allocation5], %s732_s25 }
 0x2d7   : > { %p928_p0 = pnand %p931_p13, %p1135_p6 }
 0x2d9   : > { %p929_p1 = pneg %p928_p0 }
 0x2db   : > { %1048 = dma.done.wait (%p929_p1), %s733_s28, 1664  }
 0x2dc   : > { %1050 = vsyncadd (%p929_p1), %s733_s28, 4294965632  ;;  %p14_p2 = scmp.ge.s32.totalorder %s1118_s19, 4   ;;  %s1377_s14 = smov %s1057_s15 }
 0x2dd   : > { %s1378_s15 = smov %s1061_s16  ;;  %s1379_s16 = smov %s1129_s22 }
 0x2de   : > { %s1380_s17 = smov %s1118_s19  ;;  %16 = sbr.rel (!%p14_p2) target bundleno = 5 (0x5), region = 63 }
 0x2e3   :  { %739 = vsyncpa [#allocation5], 1 }
 0x2e4   :  { %741 = vsyncpa [#allocation5 + $0x1], 1 }

</bundles_post_ra>
